<compile_context>
chip_gen: v7x
topology: tpu7x:2x2x1
jax: 0.10.0
libtpu: 0.0.40
codegen_flags: <defaults>
</compile_context>

<pallas_src>
import jax
import jax.numpy as jnp
from jax.experimental import pallas as pl
from jax.experimental.pallas import tpu as pltpu

TILE_M = 256   # node-row tile of the adjacency (output rows)
TILE_K = 256   # node-col tile of the adjacency (reduction)


# --------------------------------------------------------------------------- #
# Pass 1: h1 = relu(A @ XW1 + b1)           (XW1 = X @ W1 precomputed, bf16)
# --------------------------------------------------------------------------- #
def _layer1_kernel(cols_ref, cnts_ref, a_ref, xw1_ref, b1_ref, h1_ref, acc_ref):
    i = pl.program_id(0)
    k = pl.program_id(1)

    @pl.when(k == 0)
    def _():
        acc_ref[...] = jnp.zeros_like(acc_ref)

    # Skip compute for structurally-zero adjacency blocks (block-sparse skip).
    @pl.when(k < cnts_ref[i])
    def _():
        acc_ref[...] += jnp.dot(a_ref[...], xw1_ref[...],
                                preferred_element_type=jnp.float32)

    @pl.when(k == pl.num_programs(1) - 1)
    def _():
        # relu (binarize=False branch); F.dropout(training=False) -> identity.
        # h1 stored bf16 (both pass-2 consumers cast to bf16 anyway).
        h1_ref[...] = jnp.maximum(acc_ref[...] + b1_ref[...],
                                  0.0).astype(h1_ref.dtype)


# --------------------------------------------------------------------------- #
# Pass 2: h2 = relu((A @ h1) @ W2 + b2)
#         out = log_softmax(h1 @ WL[:H] + h2 @ WL[H:] + bl)   (lane-dense, 128)
# --------------------------------------------------------------------------- #
def _layer2_head_kernel(cols_ref, cnts_ref, a_ref, h1k_ref, h1r_ref, w2_ref,
                        b2_ref, wl1_ref, wl2_ref, bl_ref, out_ref, acc_ref):
    i = pl.program_id(0)
    k = pl.program_id(1)

    @pl.when(k == 0)
    def _():
        acc_ref[...] = jnp.zeros_like(acc_ref)

    @pl.when(k < cnts_ref[i])
    def _():
        acc_ref[...] += jnp.dot(a_ref[...], h1k_ref[...],
                                preferred_element_type=jnp.float32)

    @pl.when(k == pl.num_programs(1) - 1)
    def _():
        h2 = jnp.dot(acc_ref[...].astype(jnp.bfloat16), w2_ref[...],
                     preferred_element_type=jnp.float32) + b2_ref[...]
        h2 = jnp.maximum(h2, 0.0)          # relu; dropout(eval) -> identity

        # Fused head with the concat matmul split into its two halves
        # (no masked sub-lane concatenation scratch).  Padded logit lanes get
        # bias -1e30 so they never affect the max / log-sum-exp.
        logits = (jnp.dot(h1r_ref[...], wl1_ref[...],
                          preferred_element_type=jnp.float32)
                  + jnp.dot(h2.astype(jnp.bfloat16), wl2_ref[...],
                            preferred_element_type=jnp.float32)
                  + bl_ref[...])

        # log_softmax over classes (f32, max-stabilized).
        m = jnp.max(logits, axis=-1, keepdims=True)
        lse = m + jnp.log(jnp.sum(jnp.exp(logits - m), axis=-1, keepdims=True))
        out_ref[...] = logits - lse


# --------------------------------------------------------------------------- #
# Host-side block-sparsity structure: for each row tile, the ordered list of
# nonzero column-block indices (padded with the last valid index so padded grid
# steps re-use the already-resident block => no extra DMA) plus the count.
# --------------------------------------------------------------------------- #
def _block_structure(adj_pad, tile_m, tile_k):
    nm = adj_pad.shape[0] // tile_m
    nk = adj_pad.shape[1] // tile_k
    nz = (adj_pad != 0).reshape(nm, tile_m, nk, tile_k).any(axis=(1, 3))  # [nm, nk]
    counts = nz.sum(axis=1).astype(jnp.int32)                            # [nm]
    col_ids = jnp.arange(nk, dtype=jnp.int32)[None, :]
    sort_keys = jnp.where(nz, col_ids, col_ids + nk)                     # unique keys
    order = jnp.argsort(sort_keys, axis=1).astype(jnp.int32)             # nz blocks first
    last = jnp.take_along_axis(order, jnp.maximum(counts - 1, 0)[:, None], axis=1)
    cols = jnp.where(col_ids < counts[:, None], order, last).astype(jnp.int32)
    return cols, counts


# --------------------------------------------------------------------------- #
# Forward wrapper (adj must be a concrete array: block structure + grid size
# are computed host-side).
# --------------------------------------------------------------------------- #
def saint_forward(adj, x, params, *, tile_m=TILE_M, tile_k=TILE_K,
                  vmem_limit_bytes=32 * 1024 * 1024):
    n, in_c = x.shape
    hid = params["w1"].shape[1]
    out_c = params["wl"].shape[1]
    out_p = pl.cdiv(out_c, 128) * 128     # lane-dense padded logits width

    assert tile_k % tile_m == 0 or tile_m % tile_k == 0
    blk = max(tile_m, tile_k)
    n_pad = pl.cdiv(n, blk) * blk

    # Densify/pad directly in bf16 (no f32 N^2 temp); bf16 A halves HBM traffic.
    adj_p = jnp.pad(adj.astype(jnp.bfloat16), ((0, n_pad - n), (0, n_pad - n)))
    x_p = jnp.pad(x, ((0, n_pad - n), (0, 0)))

    # Precompute XW1 once (tiny matmul) and stream bf16 blocks in pass 1.
    xw1 = jnp.dot(x_p.astype(jnp.bfloat16), params["w1"].astype(jnp.bfloat16),
                  preferred_element_type=jnp.float32).astype(jnp.bfloat16)

    # Pre-cast resident weights; pad WL/bl to a 128-lane logits slab.
    w2 = params["w2"].astype(jnp.bfloat16)
    wl_pad = jnp.pad(params["wl"],
                     ((0, 0), (0, out_p - out_c))).astype(jnp.bfloat16)
    wl1, wl2 = wl_pad[:hid, :], wl_pad[hid:, :]
    bl_pad = jnp.full((1, out_p), -1e30, jnp.float32).at[:, :out_c].set(params["bl"])
    b1, b2 = params["b1"], params["b2"]

    cols, counts = _block_structure(adj_p, tile_m, tile_k)
    counts_h = jax.device_get(counts)
    nm = n_pad // tile_m
    kmax = max(1, int(counts_h.max()))    # compressed reduction grid
    nnz = int(counts_h.sum())
    grid = (nm, kmax)

    cparams = pltpu.CompilerParams(
        dimension_semantics=("parallel", "arbitrary"),
        vmem_limit_bytes=vmem_limit_bytes)

    # ---------------- pass 1 ----------------
    flops1 = int(2 * nnz * tile_m * tile_k * hid)
    bytes1 = int(2 * nnz * tile_m * tile_k + 2 * nnz * tile_k * hid
                 + 2 * n_pad * hid + 4 * hid)
    h1 = pl.pallas_call(
        _layer1_kernel,
        out_shape=jax.ShapeDtypeStruct((n_pad, hid), jnp.bfloat16),
        grid_spec=pltpu.PrefetchScalarGridSpec(
            num_scalar_prefetch=2,
            grid=grid,
            in_specs=[
                pl.BlockSpec((tile_m, tile_k),
                             lambda i, k, cols, cnts: (i, cols[i, k])),
                pl.BlockSpec((tile_k, hid),
                             lambda i, k, cols, cnts: (cols[i, k], 0)),
                pl.BlockSpec((1, hid), lambda i, k, cols, cnts: (0, 0)),
            ],
            out_specs=pl.BlockSpec((tile_m, hid),
                                   lambda i, k, cols, cnts: (i, 0)),
            scratch_shapes=[pltpu.VMEM((tile_m, hid), jnp.float32)],
        ),
        compiler_params=cparams,
        cost_estimate=pl.CostEstimate(flops=flops1, transcendentals=0,
                                      bytes_accessed=bytes1),
    )(cols, counts, adj_p, xw1, b1)

    # ---------------- pass 2 ----------------
    flops2 = int(2 * nnz * tile_m * tile_k * hid + 2 * n_pad * hid * hid
                 + 2 * n_pad * 2 * hid * out_p)
    bytes2 = int(2 * nnz * tile_m * tile_k + 2 * nnz * tile_k * hid
                 + 2 * n_pad * hid + 4 * n_pad * out_p
                 + 2 * hid * hid + 4 * hid * out_p)
    trans2 = int(n_pad * (out_p + 1))
    out = pl.pallas_call(
        _layer2_head_kernel,
        out_shape=jax.ShapeDtypeStruct((n_pad, out_p), jnp.float32),
        grid_spec=pltpu.PrefetchScalarGridSpec(
            num_scalar_prefetch=2,
            grid=grid,
            in_specs=[
                pl.BlockSpec((tile_m, tile_k),
                             lambda i, k, cols, cnts: (i, cols[i, k])),
                pl.BlockSpec((tile_k, hid),
                             lambda i, k, cols, cnts: (cols[i, k], 0)),   # h1 col
                pl.BlockSpec((tile_m, hid),
                             lambda i, k, cols, cnts: (i, 0)),            # h1 row
                pl.BlockSpec((hid, hid), lambda i, k, cols, cnts: (0, 0)),    # W2
                pl.BlockSpec((1, hid), lambda i, k, cols, cnts: (0, 0)),      # b2
                pl.BlockSpec((hid, out_p), lambda i, k, cols, cnts: (0, 0)),  # WL[:H]
                pl.BlockSpec((hid, out_p), lambda i, k, cols, cnts: (0, 0)),  # WL[H:]
                pl.BlockSpec((1, out_p), lambda i, k, cols, cnts: (0, 0)),    # bl
            ],
            out_specs=pl.BlockSpec((tile_m, out_p),
                                   lambda i, k, cols, cnts: (i, 0)),
            scratch_shapes=[pltpu.VMEM((tile_m, hid), jnp.float32)],
        ),
        compiler_params=cparams,
        cost_estimate=pl.CostEstimate(flops=flops2, transcendentals=trans2,
                                      bytes_accessed=bytes2),
    )(cols, counts, adj_p, h1, h1, w2, b2, wl1, wl2, bl_pad)

    return out[:n, :out_c]


# --------------------------------------------------------------------------- #
# Pure-JAX references
# --------------------------------------------------------------------------- #
def saint_reference_bf16(adj, x, params):
    """Same math as the kernel: bf16 MXU inputs, f32 accumulation/elementwise."""
    def mm(a, b):
        return jnp.dot(a.astype(jnp.bfloat16), b.astype(jnp.bfloat16),
                       preferred_element_type=jnp.float32)
    xw1 = mm(x, params["w1"])
    h1 = jnp.maximum(mm(adj, xw1) + params["b1"], 0.0)
    h2 = jnp.maximum(mm(mm(adj, h1), params["w2"]) + params["b2"], 0.0)
    logits = mm(jnp.concatenate([h1, h2], -1), params["wl"]) + params["bl"]
    return jax.nn.log_softmax(logits, axis=-1)


def saint_reference_f32(adj, x, params):
    h1 = jnp.maximum(adj @ x @ params["w1"] + params["b1"], 0.0)
    h2 = jnp.maximum(adj @ h1 @ params["w2"] + params["b2"], 0.0)
    logits = jnp.concatenate([h1, h2], -1) @ params["wl"] + params["bl"]
    return jax.nn.log_softmax(logits, axis=-1)


if __name__ == "__main__":
    N = 600      # nodes in the GraphSAINT subgraph (padded to 768 internally)
    IN_C = 8     # in_channels
    HID = 32     # hidden_channels
    OUT_C = 4    # out_channels

    key = jax.random.PRNGKey(0)
    keys = jax.random.split(key, 10)

    x = jax.random.normal(keys[0], (N, IN_C), dtype=jnp.float32)

    # Banded sparse graph: src in [dst, dst+100], so each 256-node row block of
    # the adjacency only touches <=2 column blocks -> exercises both the
    # compressed reduction grid (kmax=2 < 3 col blocks) and the block-sparse
    # skip (row block 2 has only 1 nonzero column block).
    E = 2000
    dst = jax.random.randint(keys[1], (E,), 0, N)
    off = jax.random.randint(keys[2], (E,), 0, 101)
    src = jnp.clip(dst + off, 0, N - 1)
    edge_index = jnp.stack([src, dst], axis=0)
    edge_weight = jax.random.uniform(keys[3], (E,), dtype=jnp.float32)

    # Densify: A[dst, src] = w  (add-aggregation of messages src -> dst).
    adj = (jnp.zeros((N, N), jnp.float32)
           .at[edge_index[1], edge_index[0]].add(edge_weight))

    # Parameters stored already transposed ([in, out]); Linear(2*HID, OUT_C)
    # weight kept as one (2*HID, OUT_C) slab (split into halves in the wrapper).
    params = {
        "w1": 0.1 * jax.random.normal(keys[4], (IN_C, HID), dtype=jnp.float32),
        "b1": 0.1 * jax.random.normal(keys[5], (1, HID), dtype=jnp.float32),
        "w2": 0.1 * jax.random.normal(keys[6], (HID, HID), dtype=jnp.float32),
        "b2": 0.1 * jax.random.normal(keys[7], (1, HID), dtype=jnp.float32),
        "wl": 0.1 * jax.random.normal(keys[8], (2 * HID, OUT_C), dtype=jnp.float32),
        "bl": 0.1 * jax.random.normal(keys[9], (1, OUT_C), dtype=jnp.float32),
    }

    out = jax.block_until_ready(saint_forward(adj, x, params))
    assert out.shape == (N, OUT_C)
    assert bool(jnp.all(jnp.isfinite(out)))

    ref_bf16 = saint_reference_bf16(adj, x, params)
    assert jnp.allclose(out, ref_bf16, atol=5e-3, rtol=5e-3), \
        "mismatch vs bf16-matmul reference"

    ref_f32 = saint_reference_f32(adj, x, params)
    assert jnp.allclose(out, ref_f32, atol=1e-1), \
        "mismatch vs f32 reference (sanity)"

    print("KERNEL_OK")
</pallas_src>

<mosaic_0001>
module attributes {stable_mosaic.version = 11 : i64} {
  func.func @_layer1_kernel(%arg0: i32, %arg1: i32, %arg2: memref<3x3xi32, #tpu.memory_space<smem>>, %arg3: memref<3xi32, #tpu.memory_space<smem>>, %arg4: memref<256x256xbf16, #tpu.memory_space<vmem>>, %arg5: memref<256x32xbf16, #tpu.memory_space<vmem>>, %arg6: memref<1x32xf32, #tpu.memory_space<vmem>>, %arg7: memref<256x32xbf16, #tpu.memory_space<vmem>>, %arg8: memref<256x32xf32, #tpu.memory_space<vmem>>) attributes {dimension_semantics = [#tpu.dimension_semantics<parallel>, #tpu.dimension_semantics<arbitrary>], iteration_bounds = array<i64: 3, 2>, scalar_prefetch = 2 : i64, scratch_operands = 1 : i64, tpu.core_type = #tpu.core_type<tc>, window_params = [{transform_indices = @transform_0, window_bounds = array<i64: 256, 256>}, {transform_indices = @transform_1, window_bounds = array<i64: 256, 32>}, {pipeline_mode = #tpu.pipeline_mode<synchronous>, transform_indices = @transform_2, window_bounds = array<i64: 1, 32>}, {transform_indices = @transform_3, window_bounds = array<i64: 256, 32>}]} {
    %c0_i32 = arith.constant 0 : i32
    %0 = arith.cmpi eq, %arg1, %c0_i32 : i32
    %1 = arith.extui %0 : i1 to i32
    %c0_i32_0 = arith.constant 0 : i32
    %2 = arith.cmpi ne, %1, %c0_i32_0 : i32
    scf.if %2 {
      %cst = arith.constant 0.000000e+00 : f32
      %11 = vector.broadcast %cst : f32 to vector<256x32xf32>
      %c0 = arith.constant 0 : index
      %c0_3 = arith.constant 0 : index
      %12 = vector.load %arg8[%c0, %c0_3] : memref<256x32xf32, #tpu.memory_space<vmem>>, vector<256x32xf32>
      tpu.vector_store %arg8[%c0, %c0_3], %11 {strides = array<i32>} : memref<256x32xf32, #tpu.memory_space<vmem>>, vector<256x32xf32>,
    } else {
    }
    %3 = arith.index_cast %arg0 : i32 to index
    %4 = memref.load %arg3[%3] : memref<3xi32, #tpu.memory_space<smem>>
    %5 = arith.cmpi slt, %arg1, %4 : i32
    %6 = arith.extui %5 : i1 to i32
    %c0_i32_1 = arith.constant 0 : i32
    %7 = arith.cmpi ne, %6, %c0_i32_1 : i32
    scf.if %7 {
      %c0 = arith.constant 0 : index
      %c0_3 = arith.constant 0 : index
      %11 = vector.load %arg8[%c0, %c0_3] : memref<256x32xf32, #tpu.memory_space<vmem>>, vector<256x32xf32>
      %c0_4 = arith.constant 0 : index
      %c0_5 = arith.constant 0 : index
      %12 = vector.load %arg4[%c0_4, %c0_5] : memref<256x256xbf16, #tpu.memory_space<vmem>>, vector<256x256xbf16>
      %c0_6 = arith.constant 0 : index
      %c0_7 = arith.constant 0 : index
      %13 = vector.load %arg5[%c0_6, %c0_7] : memref<256x32xbf16, #tpu.memory_space<vmem>>, vector<256x32xbf16>
      %cst = arith.constant dense<0.000000e+00> : vector<256x32xf32>
      %14 = tpu.matmul %12, %13, %cst {dimension_numbers = #tpu.dot_dimension_numbers<[1], [0], [0], [1], [0, 0, 1, 1], [], []>} : vector<256x256xbf16>, vector<256x32xbf16>, vector<256x32xf32> -> vector<256x32xf32>
      %15 = arith.addf %11, %14 : vector<256x32xf32>
      %c0_8 = arith.constant 0 : index
      %c0_9 = arith.constant 0 : index
      %16 = vector.load %arg8[%c0_8, %c0_9] : memref<256x32xf32, #tpu.memory_space<vmem>>, vector<256x32xf32>
      tpu.vector_store %arg8[%c0_8, %c0_9], %15 {strides = array<i32>} : memref<256x32xf32, #tpu.memory_space<vmem>>, vector<256x32xf32>,
    } else {
    }
    %c1_i32 = arith.constant 1 : i32
    %8 = arith.cmpi eq, %arg1, %c1_i32 : i32
    %9 = arith.extui %8 : i1 to i32
    %c0_i32_2 = arith.constant 0 : i32
    %10 = arith.cmpi ne, %9, %c0_i32_2 : i32
    scf.if %10 {
      %c0 = arith.constant 0 : index
      %c0_3 = arith.constant 0 : index
      %11 = vector.load %arg8[%c0, %c0_3] : memref<256x32xf32, #tpu.memory_space<vmem>>, vector<256x32xf32>
      %c0_4 = arith.constant 0 : index
      %c0_5 = arith.constant 0 : index
      %12 = vector.load %arg6[%c0_4, %c0_5] : memref<1x32xf32, #tpu.memory_space<vmem>>, vector<1x32xf32>
      %13 = vector.broadcast %12 : vector<1x32xf32> to vector<256x32xf32>
      %14 = arith.addf %11, %13 : vector<256x32xf32>
      %cst = arith.constant 0.000000e+00 : f32
      %15 = vector.broadcast %cst : f32 to vector<256x32xf32>
      %16 = arith.maximumf %14, %15 : vector<256x32xf32>
      %17 = arith.truncf %16 : vector<256x32xf32> to vector<256x32xbf16>
      %c0_6 = arith.constant 0 : index
      %c0_7 = arith.constant 0 : index
      %18 = vector.load %arg7[%c0_6, %c0_7] : memref<256x32xbf16, #tpu.memory_space<vmem>>, vector<256x32xbf16>
      tpu.vector_store %arg7[%c0_6, %c0_7], %17 {strides = array<i32>} : memref<256x32xbf16, #tpu.memory_space<vmem>>, vector<256x32xbf16>,
    } else {
    }
    return
  }
  func.func @transform_0(%arg0: i32, %arg1: i32, %arg2: memref<3x3xi32, #tpu.memory_space<smem>>, %arg3: memref<3xi32, #tpu.memory_space<smem>>) -> (i32, i32) {
    %0 = arith.index_cast %arg0 : i32 to index
    %1 = arith.index_cast %arg1 : i32 to index
    %2 = memref.load %arg2[%0, %1] : memref<3x3xi32, #tpu.memory_space<smem>>
    %c0_i32 = arith.constant 0 : i32
    return %arg0, %2 : i32, i32
  }
  func.func @transform_1(%arg0: i32, %arg1: i32, %arg2: memref<3x3xi32, #tpu.memory_space<smem>>, %arg3: memref<3xi32, #tpu.memory_space<smem>>) -> (i32, i32) {
    %0 = arith.index_cast %arg0 : i32 to index
    %1 = arith.index_cast %arg1 : i32 to index
    %2 = memref.load %arg2[%0, %1] : memref<3x3xi32, #tpu.memory_space<smem>>
    %c0_i32 = arith.constant 0 : i32
    %c0_i32_0 = arith.constant 0 : i32
    return %2, %c0_i32 : i32, i32
  }
  func.func @transform_2(%arg0: i32, %arg1: i32, %arg2: memref<3x3xi32, #tpu.memory_space<smem>>, %arg3: memref<3xi32, #tpu.memory_space<smem>>) -> (i32, i32) {
    %c0_i32 = arith.constant 0 : i32
    %c0_i32_0 = arith.constant 0 : i32
    %c0_i32_1 = arith.constant 0 : i32
    return %c0_i32, %c0_i32_0 : i32, i32
  }
  func.func @transform_3(%arg0: i32, %arg1: i32, %arg2: memref<3x3xi32, #tpu.memory_space<smem>>, %arg3: memref<3xi32, #tpu.memory_space<smem>>) -> (i32, i32) {
    %c0_i32 = arith.constant 0 : i32
    %c0_i32_0 = arith.constant 0 : i32
    return %arg0, %c0_i32 : i32, i32
  }
}

</mosaic_0001>

<bundles_post_ra>
// kernel: tpu_custom_call.1
= control target key start
LH: loop header
LB: loop body
LE: loop exit
PB: predicated region body
PF: predicated region fallthrough
CT: control target
= control target key end

     0   :  { %s2411_s0 = inlined_call_operand.hbm [shape: s32[3,3], index: 0, kind: input, shape index: {}]   ;;  %s2412_s2 = inlined_call_operand.hbm [shape: bf16[768,768], index: 2, kind: input, shape index: {}]   ;;  %s2413_s3 = inlined_call_operand.vmem [shape: bf16[768,32], index: 3, kind: input, shape index: {}]   ;;  %s2414_s4 = inlined_call_operand.hbm [shape: f32[1,32], index: 4, kind: input, shape index: {}]   ;;  %s2415_s5 = inlined_call_operand.vmem [shape: bf16[768,32], index: 5, kind: output, shape index: {}]   ;;  %s2416_s1 = inlined_call_operand.hbm [shape: s32[3], index: 1, kind: input, shape index: {}]  }
   0x1   :  { %2426 = sst [smem:[#allocation16_spill]] %s2414_s4  ;;  %s1761_s20 = scalar_lea.hbm %s2411_s0, 64 }
   0x2   :  { %p1762_p0 = scmp.ne.s32.totalorder %s2411_s0, %s1761_s20  ;;  %p1765_p1 = scmp.lt.u32.totalorder %s1761_s20, %s2411_s0 }
   0x4   :  { %p1767_p2 = pnand %p1765_p1, %p1762_p0 }
   0x6   :  { %1770 = shalt.err (!%p1767_p2)  }
   0x7   :  { %s1913_s25 = smov [#allocation4]   ;;  %s1771_s30 = scalar_lea.hbm %s2416_s1, 16 }
   0x8   :  { %11 = dma.hbm_to_smem %s2411_s0, 64, %s1913_s25, [#allocation3] }
   0x9   :  { %p1772_p3 = scmp.ne.s32.totalorder %s2416_s1, %s1771_s30  ;;  %p1775_p4 = scmp.lt.u32.totalorder %s1771_s30, %s2416_s1 }
   0xb   :  { %p1777_p5 = pnand %p1775_p4, %p1772_p3 }
   0xd   :  { %1780 = shalt.err (!%p1777_p5)  }
   0xe   :  { %s1914_s10 = smov [#allocation5]  }
   0xf   :  { %13 = dma.hbm_to_smem %s2416_s1, 16, %s1914_s10, [#allocation3] }
  0x10   :  { %1871 = dma.done.wait [#allocation3], 80 }
  0x11   :  { %1872 = vsyncadd [#allocation3], 4294967216 }
  0x12   :  { %15 = sfence }
  0x13   :  { %16 = vsyncpa [#allocation7], 0 }
  0x14   :  { %18 = vsyncpa [#allocation7 + $0x1], 0 }
  0x15   :  { %19 = vsyncpa [#allocation9], 0  ;;  %s1975_s0 = smov 0   ;;  %s1977_s13 = smov 0  }
  0x16   :  { %s1979_s14 = smov 0   ;;  %s1981_s15 = smov 0  }
  0x17   :  { %s1983_s16 = smov 0   ;;  %s1985_s17 = smov 0  }
  0x18   :  { %s1987_s18 = smov 0   ;;  %s1989_s1 = smov 0  }
  0x19 LB: > { %s1335_s19 = sadd.s32 4294967295, %s1911_s1   ;;  %s34_s20 = sadd.s32 1, %s1903_s17  ;;  %s1911_s1 = sphi %s1989_s1, %s25_s1   ;;  %s1907_s18 = sphi %s1987_s18, %s2449_s18   ;;  %s1903_s17 = sphi %s1985_s17, %s2448_s17   ;;  %s1899_s16 = sphi %s1983_s16, %s2447_s16   ;;  %s1895_s15 = sphi %s1981_s15, %s2446_s15   ;;  %s1891_s14 = sphi %s1979_s14, %s2445_s14   ;;  %s1887_s13 = sphi %s1977_s13, %s2444_s13   ;;  %s1883_s0 = sphi %s1975_s0, %s2443_s0  }
  0x1a   : > { %p35_p6 = scmp.ge.s32.totalorder %s34_s20, 2  ;;  %s37_s21 = sadd.s32 1, %s1907_s18 }
  0x1b   : > { %s41_s22 = sshra.s32 %s1903_s17, 7  ;;  %s46_s23 = sand.u32 127, %s1903_s17 }
  0x1c   : > { %s2451_s20 = smov (%p35_p6, %s34_s20), 0  ;;  %s2453_s21 = smov (!%p35_p6, %s37_s21), %s1907_s18 }
  0x1d   : > { %s43_s24 = sadd.s32 %s1907_s18, %s41_s22  ;;  %s49_s25 = sshra.s32 %s2451_s20, 7 }
  0x1e   : > { %p39_p7 = scmp.ge.s32.totalorder %s2453_s21, 3  ;;  %s1337_s26 = sshll.u32 %s43_s24, 7 }
  0x1f   : > { %s2025_s27 = sadd.s32 %s1337_s26, %s46_s23  ;;  %s54_s28 = sand.u32 127, %s2451_s20 }
  0x20   : > { %s2455_s21 = smov (%p39_p7, %s2453_s21), 0  ;;  %s48_s29 = sld [smem:[#allocation4 + %s2025_s27]] }
  0x21   : > { %2427 = sst [smem:[#allocation15_spill]] %s2455_s21  ;;  %s62_s30 = sadd.s32 1, %s1891_s14 }
  0x22   : > { %s51_s6 = sadd.s32 %s49_s25, %s2455_s21  ;;  %s57_s7 = ssub.s32 %s1907_s18, %s2455_s21 }
  0x23   : > { %s1338_s8 = sshll.u32 %s51_s6, 7  ;;  %p69_p8 = scmp.ne.s32.totalorder %s1891_s14, %s1887_s13 }
  0x24   : > { %s55_s9 = sadd.s32 %s1338_s8, %s54_s28  ;;  %p70_p9 = scmp.eq.s32.totalorder %s1911_s1, 0 }
  0x25   : > { %s56_s10 = sld [smem:[#allocation4 + %s55_s9]]  ;;  %p75_p10 = scmp.ne.s32.totalorder %s1887_s13, %s1883_s0 }
  0x26   : > { %p2040_p11 = por %p70_p9, %p69_p8  ;;  %p2044_p12 = scmp.eq.s32.totalorder %s1335_s19, 0 }
  0x27   : > { %p1341_p13 = scmp.ge.s32.totalorder %s1911_s1, 1  ;;  %p175_p0 = scmp.lt.s32.totalorder %s1911_s1, 7 }
  0x28   : > { %s2428_s11 = scalar_select %p2040_p11, 1, 0 }
  0x29   : > { %s2429_s12 = scalar_select %p2044_p12, 1, 0 }
  0x2a   : > { %p2052_p1 = por %p2044_p12, %p75_p10  ;;  %p2056_p2 = pnand %p1341_p13, %p175_p0 }
  0x2b   : > { %s1915_s19 = smov [#allocation8]   ;;  %s58_s24 = ssub.s32 %s48_s29, %s56_s10 }
  0x2c   : > { %s2430_s22 = scalar_select %p2052_p1, 1, 0 }
  0x2d   : > { %s2431_s0 = scalar_select %p2056_p2, 1, 0 }
  0x2e   : > { %s188_s23 = sshll.u32 %s1915_s19, 4  ;;  %p1613_p3 = pneg %p2056_p2  ;;  %s189_s23 = int_to_ptr.vmem [resolvable:$true] %s188_s23 }
  0x2f   : > { %s59_s25 = sor.u32 %s58_s24, %s57_s7  ;;  %p2417_p6 = scmp.lt.s32.totalorder %s1911_s1, 6 }
  0x30   : > { %p60_p4 = scmp.eq.s32.totalorder %s59_s25, 0  ;;  %p2064_p5 = pnand %p1613_p3, %p2044_p12 }
  0x31   : > { %s199_s28 = sand.u32 1, %s1891_s14   ;;  %p2077_p7 = pnand %p2417_p6, %p2040_p11 }
  0x32   : > { %s2071_s6 = scalar_select %p60_p4, %s1891_s14, %s62_s30  }
  0x33   : > { %s2433_s8 = scalar_select %p2077_p7, 1, 0 }
  0x34   : > { %s2434_s4 = sld [smem:[#allocation16_spill]]  ;;  %p1783_p9 = pneg %p2064_p5 }
  0x3a   : > { %s1781_s9 = scalar_lea.hbm %s2434_s4, 16 }
  0x3b   : > { %p1782_p8 = scmp.ne.s32.totalorder %s2434_s4, %s1781_s9  ;;  %p1788_p0 = scmp.lt.u32.totalorder %s1781_s9, %s2434_s4 }
  0x3d   : > { %p1784_p10 = pnand %p1783_p9, %p1782_p8 }
  0x3f   : > { %p1785_p13 = pneg %p1784_p10 }
  0x41   : > { %p1790_p3 = pnand %p1788_p0, %p1785_p13 }
  0x43   : > { %1793 = shalt.err (!%p1790_p3)
}
  0x44   : > { %s1794_s25 = scalar_lea.vmem %s189_s23, 16  ;;  %s1801_s29 = scalar_lea.vmem %s189_s23, 32 }
  0x45   : > { %p1795_p4 = scmp.ne.s32.totalorder %s189_s23, %s1794_s25  ;;  %p1802_p1 = scmp.lt.s32.totalorder %s189_s23, %s189_s23 }
  0x46   : > { %p1803_p2 = scmp.lt.s32.totalorder %s1801_s29, %s1794_s25 }
  0x47   : > { %p1797_p6 = pnand %p1795_p4, %p1783_p9 }
  0x48   : > { %p1804_p7 = por %p1803_p2, %p1802_p1 }
  0x49   : > { %p1798_p12 = pneg %p1797_p6 }
  0x4b   : > { %p1805_p11 = pnand %p1804_p7, %p1798_p12 }
  0x4d   : > { %1808 = shalt.err (!%p1805_p11)
}
  0x4e   : > { %1616 = dma.hbm_to_vmem [thread:$0]  (!%p2064_p5), %s2434_s4, 16, %s189_s23, [#allocation9]  }
  0x4f   : > { %p2435_p6 = scmp.ne.s32.totalorder %s2428_s11, 0  ;;  %s1344_s19 = sshll.u32 %s199_s28, 8 }
  0x50   : > { %p2436_p11 = scmp.lt.s32.totalorder %s1911_s1, 6  ;;  %s1604_s30 = smul.u32 192, %s1907_s18 }
  0x51   : > { %s1607_s9 = scalar_select %p2435_p6, [#allocation4], [#allocation10] }
  0x52   : > { %s2457_s27 = smov (!%p2435_p6, %s2025_s27), 0  ;;  %p2437_p12 = pmov %p2436_p11 }
  0x53   : > { %s2459_s9 = smov (!%p2436_p11, %s1607_s9), [#allocation11]  ;;  %s203_s24 = scalar_lea.vmem [#allocation6], %s1344_s19 }
  0x54   : > { %s2461_s27 = smov (!%p2437_p12, %s2457_s27), 0  ;;  %s221_s25 = sshll.u32 %s203_s24, 4  ;;  %s2109_s25 = int_to_ptr.vmem [resolvable:$true] %s221_s25 }
  0x55   : > { %s211_s26 = sld [smem:[%s2459_s9 + %s2461_s27]]  ;;  %s2118_s21 = scalar_lea.sflag [#allocation7], %s199_s28 }
  0x56   : > { %p2438_p2 = scmp.ne.s32.totalorder %s2433_s8, 0 }
  0x58   : > { %p1811_p5 = pneg %p2438_p2 }
  0x5b   : > { %s1347_s29 = sshll.u32 %s211_s26, 1  ;;  %s1814_s26 = scalar_lea.hbm %s2412_s2, 36864 }
  0x5c   : > { %s218_s23 = sadd.s32 %s1604_s30, %s1347_s29 }
  0x5d   : > { %s1349_s7 = sshll.u32 %s218_s23, 6 }
  0x5e   : > { %s2114_s4 = scalar_lea.hbm %s2412_s2, %s1349_s7 }
  0x5f   : > { %s1809_s27 = scalar_lea.hbm %s2114_s4, 4096  ;;  %p1815_p9 = scmp.lt.u32.totalorder %s2114_s4, %s2412_s2 }
  0x60   : > { %p1810_p1 = scmp.ne.s32.totalorder %s2114_s4, %s1809_s27  ;;  %p1816_p10 = scmp.lt.u32.totalorder %s1814_s26, %s1809_s27 }
  0x61   : > { %p1818_p0 = scmp.lt.u32.totalorder %s1809_s27, %s2114_s4 }
  0x62   : > { %p1812_p7 = pnand %p1811_p5, %p1810_p1  ;;  %p1817_p13 = por %p1816_p10, %p1815_p9 }
  0x64   : > { %p1813_p8 = pneg %p1812_p7  ;;  %p1819_p3 = por %p1818_p0, %p1817_p13 }
  0x66   : > { %p1820_p4 = pnand %p1819_p3, %p1813_p8 }
  0x68   : > { %1823 = shalt.err (!%p1820_p4)
}
  0x69   : > { %s1824_s28 = scalar_lea.vmem %s2109_s25, 4096  ;;  %s1916_s29 = smov [#allocation6]  }
  0x6a   : > { %p1825_p6 = scmp.ne.s32.totalorder %s2109_s25, %s1824_s28  ;;  %s1829_s23 = sshll.u32 %s1916_s29, 4  ;;  %s1830_s23 = int_to_ptr.vmem [resolvable:$false] %s1829_s23 }
  0x6b   : > { %s1831_s7 = scalar_lea.vmem %s1830_s23, 8192  ;;  %p1832_p1 = scmp.lt.s32.totalorder %s2109_s25, %s1830_s23 }
  0x6c   : > { %p1827_p11 = pnand %p1825_p6, %p1811_p5  ;;  %p1833_p7 = scmp.lt.s32.totalorder %s1831_s7, %s1824_s28 }
  0x6e   : > { %p1828_p12 = pneg %p1827_p11  ;;  %p1834_p9 = por %p1833_p7, %p1832_p1 }
  0x70   : > { %p1835_p10 = pnand %p1834_p9, %p1828_p12 }
  0x72   : > { %1838 = shalt.err (!%p1835_p10)
}
  0x73   : > { %s1917_s10 = smov 384   ;;  %s1918_s11 = smov 128  }
  0x74   : > { %s1919_s27 = smov 8   ;;  %p2439_p5 = scmp.ne.s32.totalorder %s2431_s0, 0 }
  0x75   : > { %1622 = dma.hbm_to_vmem [thread:$0]  (!%p2438_p2), %s2114_s4, 4096, %s2109_s25, %s2118_s21, %s1917_s10, %s1918_s11, %s1919_s27  }
  0x76   : > { %258 = sbr.rel (%p2439_p5) target bundleno = 497 (0x1f1), region = 32  ;;  %s260_s9 = sand.u32 (!%p2439_p5), 1, %s1887_s13  }
  0x77   : > { %s1351_s19 = sshll.u32 (!%p2439_p5), %s260_s9, 8  ;;  %s261_s26 = scalar_lea.sflag (!%p2439_p5), [#allocation7], %s260_s9 }
  0x78   : > { %s2149_s30 = scalar_lea.vmem (!%p2439_p5), [#allocation6], %s1351_s19  ;;  %p2440_p8 = scmp.ne.s32.totalorder (!%p2439_p5), %s2430_s22, 0 }
  0x7d   : > { %1874 = dma.done.wait (%p2440_p8), %s261_s26, 4096  }
  0x7e   : > { %1876 = vsyncadd (%p2440_p8), %s261_s26, 4294963200  ;;  %p2441_p13 = scmp.ne.s32.totalorder %s2429_s12, 0 }
  0x80   : > { %1878 = dma.done.wait (%p2441_p13), [#allocation9], 16  }
  0x81   : > { %1880 = vsyncadd (%p2441_p13), [#allocation9], 4294967280  ;;  %s314_s4 = sshra.s32 %s1895_s15, 7  ;;  %s319_s21 = sand.u32 127, %s1895_s15 }
  0x82   : > { %s316_s0 = sadd.s32 %s1899_s16, %s314_s4  ;;  %s1356_s8 = sshll.u32 %s1899_s16, 5 }
  0x83   : > { %s1353_s25 = sshll.u32 %s316_s0, 7  ;;  %p337_p2 = scmp.lt.s32.totalorder %s1356_s8, 95 }
  0x84   : > { %s320_s24 = sadd.s32 %s1353_s25, %s319_s21  ;;  %p1358_p3 = scmp.ne.s32.totalorder %s1895_s15, 0 }
  0x85   : > { %s321_s28 = sld [smem:[#allocation4 + %s320_s24]]  ;;  %s2463_s8 = smov (!%p337_p2, %s1356_s8), 95  ;;  %vm347_vm0 = vcmask (!%p1358_p3), 261120   ;;  %v1920_v0 = vmov (!%p1358_p3), 0.0  }
  0x86   : > { %s1357_s22 = sshll.u32 %s2463_s8, 2  ;;  %348 = vst.msk [vmem:[#allocation2] sm:$0xff] (!%p1358_p3), %vm347_vm0, %v1920_v0  ;;  %349 = vst.msk [vmem:[#allocation2 + $0x8] sm:$0xff] (!%p1358_p3), %vm347_vm0, %v1920_v0 }
  0x87   : > { %s2166_s7 = scalar_lea.vmem %s2415_s5, %s1357_s22  ;;  %350 = vst.msk [vmem:[#allocation2 + $0x10] sm:$0xff] (!%p1358_p3), %vm347_vm0, %v1920_v0  ;;  %351 = vst.msk [vmem:[#allocation2 + $0x18] sm:$0xff] (!%p1358_p3), %vm347_vm0, %v1920_v0 }
  0x88   : > { %352 = vst.msk [vmem:[#allocation2 + $0x20] sm:$0xff] (!%p1358_p3), %vm347_vm0, %v1920_v0  ;;  %353 = vst.msk [vmem:[#allocation2 + $0x28] sm:$0xff] (!%p1358_p3), %vm347_vm0, %v1920_v0 }
  0x89   : > { %354 = vst.msk [vmem:[#allocation2 + $0x30] sm:$0xff] (!%p1358_p3), %vm347_vm0, %v1920_v0  ;;  %355 = vst.msk [vmem:[#allocation2 + $0x38] sm:$0xff] (!%p1358_p3), %vm347_vm0, %v1920_v0 }
  0x8a   : > { %346 = sbr.rel (%p1358_p3) target bundleno = 150 (0x96), region = 44  ;;  %356 = vst.msk [vmem:[#allocation2 + $0x40] sm:$0xff] (!%p1358_p3), %vm347_vm0, %v1920_v0  ;;  %357 = vst.msk [vmem:[#allocation2 + $0x48] sm:$0xff] (!%p1358_p3), %vm347_vm0, %v1920_v0 }
  0x8b   : > { %s1354_s12 = sshll.u32 %s321_s28, 5  ;;  %358 = vst.msk [vmem:[#allocation2 + $0x50] sm:$0xff] (!%p1358_p3), %vm347_vm0, %v1920_v0  ;;  %359 = vst.msk [vmem:[#allocation2 + $0x58] sm:$0xff] (!%p1358_p3), %vm347_vm0, %v1920_v0 }
  0x8c   : > { %p323_p0 = scmp.lt.s32.totalorder %s1354_s12, 95  ;;  %360 = vst.msk [vmem:[#allocation2 + $0x60] sm:$0xff] (!%p1358_p3), %vm347_vm0, %v1920_v0  ;;  %361 = vst.msk [vmem:[#allocation2 + $0x68] sm:$0xff] (!%p1358_p3), %vm347_vm0, %v1920_v0 }
  0x8d   : > { %362 = vst.msk [vmem:[#allocation2 + $0x70] sm:$0xff] (!%p1358_p3), %vm347_vm0, %v1920_v0  ;;  %363 = vst.msk [vmem:[#allocation2 + $0x78] sm:$0xff] (!%p1358_p3), %vm347_vm0, %v1920_v0 }
  0x8e   : > { %s2465_s12 = smov (!%p323_p0, %s1354_s12), 95  ;;  %364 = vst.msk [vmem:[#allocation2 + $0x80] sm:$0xff] (!%p1358_p3), %vm347_vm0, %v1920_v0  ;;  %365 = vst.msk [vmem:[#allocation2 + $0x88] sm:$0xff] (!%p1358_p3), %vm347_vm0, %v1920_v0 }
  0x8f   : > { %s1355_s10 = sshll.u32 %s2465_s12, 2  ;;  %366 = vst.msk [vmem:[#allocation2 + $0x90] sm:$0xff] (!%p1358_p3), %vm347_vm0, %v1920_v0  ;;  %367 = vst.msk [vmem:[#allocation2 + $0x98] sm:$0xff] (!%p1358_p3), %vm347_vm0, %v1920_v0 }
  0x90   : > { %s2171_s9 = scalar_lea.vmem %s2413_s3, %s1355_s10  ;;  %368 = vst.msk [vmem:[#allocation2 + $0xa0] sm:$0xff] (!%p1358_p3), %vm347_vm0, %v1920_v0  ;;  %369 = vst.msk [vmem:[#allocation2 + $0xa8] sm:$0xff] (!%p1358_p3), %vm347_vm0, %v1920_v0 }
  0x91   : > { %370 = vst.msk [vmem:[#allocation2 + $0xb0] sm:$0xff] %vm347_vm0, %v1920_v0  ;;  %371 = vst.msk [vmem:[#allocation2 + $0xb8] sm:$0xff] %vm347_vm0, %v1920_v0 }
  0x92   : > { %372 = vst.msk [vmem:[#allocation2 + $0xc0] sm:$0xff] %vm347_vm0, %v1920_v0  ;;  %373 = vst.msk [vmem:[#allocation2 + $0xc8] sm:$0xff] %vm347_vm0, %v1920_v0 }
  0x93   : > { %374 = vst.msk [vmem:[#allocation2 + $0xd0] sm:$0xff] %vm347_vm0, %v1920_v0  ;;  %375 = vst.msk [vmem:[#allocation2 + $0xd8] sm:$0xff] %vm347_vm0, %v1920_v0 }
  0x94   : > { %376 = vst.msk [vmem:[#allocation2 + $0xe0] sm:$0xff] %vm347_vm0, %v1920_v0  ;;  %377 = vst.msk [vmem:[#allocation2 + $0xe8] sm:$0xff] %vm347_vm0, %v1920_v0 }
  0x95   : > { %378 = vst.msk [vmem:[#allocation2 + $0xf0] sm:$0xff] %vm347_vm0, %v1920_v0  ;;  %379 = vst.msk [vmem:[#allocation2 + $0xf8] sm:$0xff] %vm347_vm0, %v1920_v0 }
  0x96 PF: > { %s380_s19 = sld [smem:[#allocation5 + %s1899_s16]] }
  0x9c   : > { %p1359_p4 = scmp.ge.s32.totalorder %s1895_s15, %s380_s19 }
  0x9d   : > { %v1697_v1 = vld [vmem:[%s2171_s9 + $0x40] sm:$0xff] (!%p1359_p4)   ;;  %v1699_v3 = vld [vmem:[%s2171_s9 + $0x48] sm:$0xff] (!%p1359_p4)   ;;  %v1701_v5 = vld [vmem:[%s2171_s9 + $0x50] sm:$0xff] (!%p1359_p4)   ;;  %vm930_vm1 = vcmask (!%p1359_p4), 261120  }
  0x9e   : > { %384 = sbr.rel (%p1359_p4) target bundleno = 466 (0x1d2), region = 48  ;;  %v1698_v2 = vld [vmem:[%s2171_s9] sm:$0xff] (!%p1359_p4)   ;;  %1476 = vmatprep.subr.bf16.mxu0 (!%p1359_p4), %v1697_v1  ;;  %1588 = vmatprep.subr.bf16.mxu1 (!%p1359_p4), %v1697_v1  ;;  %v1700_v4 = vld [vmem:[%s2171_s9 + $0x8] sm:$0xff] (!%p1359_p4)   ;;  %v1702_v6 = vld [vmem:[%s2171_s9 + $0x10] sm:$0xff] (!%p1359_p4)  }
  0x9f   : > { %1477 = vmatpush3.bf16.msra.mxu0 (!%p1359_p4), %v1698_v2  ;;  %1596 = vmatpush3.bf16.msra.mxu1 (!%p1359_p4), %v1698_v2  ;;  %v1703_v7 = vld [vmem:[%s2171_s9 + $0x58] sm:$0xff] (!%p1359_p4)   ;;  %v1705_v9 = vld [vmem:[%s2171_s9 + $0x60] sm:$0xff] (!%p1359_p4)   ;;  %v1707_v11 = vld [vmem:[%s2171_s9 + $0x68] sm:$0xff] (!%p1359_p4)  }
  0xa0   : > { %1478 = vmatprep.subr.bf16.mxu0 (!%p1359_p4), %v1699_v3  ;;  %1589 = vmatprep.subr.bf16.mxu1 (!%p1359_p4), %v1699_v3  ;;  %v1704_v8 = vld [vmem:[%s2171_s9 + $0x18] sm:$0xff] (!%p1359_p4)   ;;  %v1706_v10 = vld [vmem:[%s2171_s9 + $0x20] sm:$0xff] (!%p1359_p4)   ;;  %v1708_v14 = vld [vmem:[%s2171_s9 + $0x28] sm:$0xff] (!%p1359_p4)  }
  0xa1   : > { %v1715_v12 = vld [vmem:[%s2149_s30 + $0x4] ss:$8 sps:$4 sm:$0xff] (!%p1359_p4)   ;;  %v1709_v15 = vld [vmem:[%s2171_s9 + $0x70] sm:$0xff] (!%p1359_p4)   ;;  %v1711_v17 = vld [vmem:[%s2171_s9 + $0x78] sm:$0xff] (!%p1359_p4)  }
  0xa2   : > { %v1718_v13 = vld [vmem:[%s2149_s30 + $0x84] ss:$8 sps:$4 sm:$0xff] (!%p1359_p4)   ;;  %769 = vmatprep.mubr.bf16.mxu0 (!%p1359_p4), %v1715_v12  ;;  %v1710_v16 = vld [vmem:[%s2171_s9 + $0x30] sm:$0xff] (!%p1359_p4)   ;;  %v1712_v18 = vld [vmem:[%s2171_s9 + $0x38] sm:$0xff] (!%p1359_p4)  }
  0xa3   : > { %1479 = vmatpush3.bf16.msra.mxu0 (!%p1359_p4), %v1700_v4  ;;  %1597 = vmatpush3.bf16.msra.mxu1 (!%p1359_p4), %v1700_v4  ;;  %v1713_v19 = vld [vmem:[%s2149_s30] ss:$8 sps:$4 sm:$0xff] (!%p1359_p4)   ;;  %v1719_v21 = vld [vmem:[%s2149_s30 + $0x14] ss:$8 sps:$4 sm:$0xff] (!%p1359_p4)   ;;  %v1723_v23 = vld [vmem:[%s2149_s30 + $0x10] ss:$8 sps:$4 sm:$0xff] (!%p1359_p4)  }
  0xa4   : > { %1480 = vmatprep.subr.bf16.mxu0 (!%p1359_p4), %v1701_v5  ;;  %1590 = vmatprep.subr.bf16.mxu1 (!%p1359_p4), %v1701_v5  ;;  %v1716_v20 = vld [vmem:[%s2149_s30 + $0x80] ss:$8 sps:$4 sm:$0xff] (!%p1359_p4)   ;;  %v1721_v22 = vld [vmem:[%s2149_s30 + $0x94] ss:$8 sps:$4 sm:$0xff] (!%p1359_p4)   ;;  %v1724_v24 = vld [vmem:[%s2149_s30 + $0x90] ss:$8 sps:$4 sm:$0xff] (!%p1359_p4)  }
  0xa5   : > { %833 = vmatprep.mubr.bf16.mxu1 %v1718_v13  ;;  %v1725_v25 = vld [vmem:[%s2149_s30 + $0x24] ss:$8 sps:$4 sm:$0xff]   ;;  %v1729_v27 = vld [vmem:[%s2149_s30 + $0x20] ss:$8 sps:$4 sm:$0xff]   ;;  %v1731_v29 = vld [vmem:[%s2149_s30 + $0x34] ss:$8 sps:$4 sm:$0xff]  }
  0xa6   : > { %v1727_v26 = vld [vmem:[%s2149_s30 + $0xa4] ss:$8 sps:$4 sm:$0xff]   ;;  %v1730_v28 = vld [vmem:[%s2149_s30 + $0xa0] ss:$8 sps:$4 sm:$0xff]   ;;  %v1733_v30 = vld [vmem:[%s2149_s30 + $0xb4] ss:$8 sps:$4 sm:$0xff]  }
  0xa7   : > { %1481 = vmatpush3.bf16.msra.mxu0 %v1702_v6  ;;  %1598 = vmatpush3.bf16.msra.mxu1 %v1702_v6  ;;  %v1735_v31 = vld [vmem:[%s2149_s30 + $0x30] ss:$8 sps:$4 sm:$0xff]   ;;  %v1737_v33 = vld [vmem:[%s2149_s30 + $0x44] ss:$8 sps:$4 sm:$0xff]   ;;  %v1741_v35 = vld [vmem:[%s2149_s30 + $0x40] ss:$8 sps:$4 sm:$0xff]  }
  0xa8   : > { %1482 = vmatprep.subr.bf16.mxu0 %v1703_v7  ;;  %1591 = vmatprep.subr.bf16.mxu1 %v1703_v7  ;;  %v1736_v32 = vld [vmem:[%s2149_s30 + $0xb0] ss:$8 sps:$4 sm:$0xff]   ;;  %v1739_v34 = vld [vmem:[%s2149_s30 + $0xc4] ss:$8 sps:$4 sm:$0xff]   ;;  %v1742_v36 = vld [vmem:[%s2149_s30 + $0xc0] ss:$8 sps:$4 sm:$0xff]  }
  0xa9   : > { %v1743_v37 = vld [vmem:[%s2149_s30 + $0x54] ss:$8 sps:$4 sm:$0xff]   ;;  %v1747_v39 = vld [vmem:[%s2149_s30 + $0x50] ss:$8 sps:$4 sm:$0xff]   ;;  %v1749_v41 = vld [vmem:[%s2149_s30 + $0x64] ss:$8 sps:$4 sm:$0xff]  }
  0xaa   : > { %v1745_v38 = vld [vmem:[%s2149_s30 + $0xd4] ss:$8 sps:$4 sm:$0xff]   ;;  %v1748_v40 = vld [vmem:[%s2149_s30 + $0xd0] ss:$8 sps:$4 sm:$0xff]   ;;  %v1751_v42 = vld [vmem:[%s2149_s30 + $0xe4] ss:$8 sps:$4 sm:$0xff]  }
  0xab   : > { %1483 = vmatpush3.bf16.msra.mxu0 %v1704_v8  ;;  %1599 = vmatpush3.bf16.msra.mxu1 %v1704_v8  ;;  %v1753_v43 = vld [vmem:[%s2149_s30 + $0x60] ss:$8 sps:$4 sm:$0xff]   ;;  %v1755_v45 = vld [vmem:[%s2149_s30 + $0x74] ss:$8 sps:$4 sm:$0xff]   ;;  %v1759_v47 = vld [vmem:[%s2149_s30 + $0x70] ss:$8 sps:$4 sm:$0xff]  }
  0xac   : > { %1484 = vmatprep.subr.bf16.mxu0 %v1705_v9  ;;  %1592 = vmatprep.subr.bf16.mxu1 %v1705_v9  ;;  %v1754_v44 = vld [vmem:[%s2149_s30 + $0xe0] ss:$8 sps:$4 sm:$0xff]   ;;  %v1757_v46 = vld [vmem:[%s2149_s30 + $0xf4] ss:$8 sps:$4 sm:$0xff]   ;;  %v1760_v48 = vld [vmem:[%s2149_s30 + $0xf0] ss:$8 sps:$4 sm:$0xff]  }
  0xad   : > { %v385_v51 = vld [vmem:[#allocation2] sm:$0xff]  ;;  %v386_v59 = vld [vmem:[#allocation2 + $0x8] sm:$0xff]  ;;  %v387_v7 = vld [vmem:[#allocation2 + $0x10] sm:$0xff] }
  0xae   : > { %v401_v53 = vld [vmem:[#allocation2 + $0x80] sm:$0xff]  ;;  %v402_v61 = vld [vmem:[#allocation2 + $0x88] sm:$0xff]  ;;  %v403_v9 = vld [vmem:[#allocation2 + $0x90] sm:$0xff] }
  0xaf   : > { %1485 = vmatpush3.bf16.msra.mxu0 %v1706_v10  ;;  %1600 = vmatpush3.bf16.msra.mxu1 %v1706_v10 }
  0xb0   : > { %1486 = vmatprep.subr.bf16.mxu0 %v1707_v11  ;;  %1593 = vmatprep.subr.bf16.mxu1 %v1707_v11 }
  0xb3   : > { %1487 = vmatpush3.bf16.msra.mxu0 %v1708_v14  ;;  %1601 = vmatpush3.bf16.msra.mxu1 %v1708_v14 }
  0xb4   : > { %1488 = vmatprep.subr.bf16.mxu0 %v1709_v15  ;;  %1594 = vmatprep.subr.bf16.mxu1 %v1709_v15  ;;  %v388_v15 = vld [vmem:[#allocation2 + $0x18] sm:$0xff] }
  0xb7   : > { %1489 = vmatpush3.bf16.msra.mxu0 %v1710_v16  ;;  %1602 = vmatpush3.bf16.msra.mxu1 %v1710_v16 }
  0xb8   : > { %1490 = vmatprep.subr.bf16.mxu0 %v1711_v17  ;;  %1595 = vmatprep.subr.bf16.mxu1 %v1711_v17  ;;  %v404_v17 = vld [vmem:[#allocation2 + $0x98] sm:$0xff] }
  0xbb   : > { %1491 = vmatpush3.bf16.msra.mxu0 %v1712_v18  ;;  %1603 = vmatpush3.bf16.msra.mxu1 %v1712_v18 }
  0xbe   : > { %770 = vmatmul.mubr.bf16.vlgmr.msra.gmra.mrb[0].mxu0 %v1713_v19  ;;  %834 = vmatmul.mubr.bf16.vlgmr.msra.gmra.mrb[0].mxu1 %v1716_v20 }
  0xbf   : > { %777 = vmatprep.mubr.bf16.mxu0 %v1719_v21  ;;  %841 = vmatprep.mubr.bf16.mxu1 %v1721_v22 }
  0xc6   : > { %778 = vmatmul.mubr.bf16.gmra.mrb[4].mxu0 %v1723_v23  ;;  %842 = vmatmul.mubr.bf16.gmra.mrb[4].mxu1 %v1724_v24 }
  0xc7   : > { %785 = vmatprep.mubr.bf16.mxu0 %v1725_v25  ;;  %849 = vmatprep.mubr.bf16.mxu1 %v1727_v26 }
  0xce   : > { %786 = vmatmul.mubr.bf16.gmra.mrb[8].mxu0 %v1729_v27  ;;  %850 = vmatmul.mubr.bf16.gmra.mrb[8].mxu1 %v1730_v28  ;;  %v389_v27 = vld [vmem:[#allocation2 + $0x20] sm:$0xff] }
  0xcf   : > { %793 = vmatprep.mubr.bf16.mxu0 %v1731_v29  ;;  %857 = vmatprep.mubr.bf16.mxu1 %v1733_v30  ;;  %v405_v29 = vld [vmem:[#allocation2 + $0xa0] sm:$0xff] }
  0xd6   : > { %794 = vmatmul.mubr.bf16.gmra.mrb[12].mxu0 %v1735_v31  ;;  %858 = vmatmul.mubr.bf16.gmra.mrb[12].mxu1 %v1736_v32 }
  0xd7   : > { %801 = vmatprep.mubr.bf16.mxu0 %v1737_v33  ;;  %865 = vmatprep.mubr.bf16.mxu1 %v1739_v34 }
  0xde   : > { %802 = vmatmul.mubr.bf16.gmra.mrb[16].mxu0 %v1741_v35  ;;  %866 = vmatmul.mubr.bf16.gmra.mrb[16].mxu1 %v1742_v36  ;;  %v390_v35 = vld [vmem:[#allocation2 + $0x28] sm:$0xff] }
  0xdf   : > { %809 = vmatprep.mubr.bf16.mxu0 %v1743_v37  ;;  %873 = vmatprep.mubr.bf16.mxu1 %v1745_v38  ;;  %v406_v37 = vld [vmem:[#allocation2 + $0xa8] sm:$0xff] }
  0xe6   : > { %810 = vmatmul.mubr.bf16.gmra.mrb[20].mxu0 %v1747_v39  ;;  %874 = vmatmul.mubr.bf16.gmra.mrb[20].mxu1 %v1748_v40 }
  0xe7   : > { %817 = vmatprep.mubr.bf16.mxu0 %v1749_v41  ;;  %881 = vmatprep.mubr.bf16.mxu1 %v1751_v42 }
  0xee   : > { %818 = vmatmul.mubr.bf16.gmra.mrb[24].mxu0 %v1753_v43  ;;  %882 = vmatmul.mubr.bf16.gmra.mrb[24].mxu1 %v1754_v44 }
  0xef   : > { %825 = vmatprep.mubr.bf16.mxu0 %v1755_v45  ;;  %889 = vmatprep.mubr.bf16.mxu1 %v1757_v46 }
  0xf6   : > { %826 = vmatmul.mubr.bf16.gmra.mrb[28].mxu0 %v1759_v47  ;;  %890 = vmatmul.mubr.bf16.gmra.mrb[28].mxu1 %v1760_v48  ;;  %v391_v47 = vld [vmem:[#allocation2 + $0x30] sm:$0xff] }
 0x191   : > { %v1492_v49 = vpop.f32.mrb[0].mxu0  ;;  %v1540_v50 = vpop.f32.mrb[0].mxu1 }
 0x192   : > { %v1493_v52 = vpop.f32.mrb[1].mxu0  ;;  %v1541_v54 = vpop.f32.mrb[1].mxu1 }
 0x193   : > { %v1494_v55 = vadd.f32 %v1493_v52, %v1492_v49  ;;  %v1542_v56 = vadd.f32 %v1541_v54, %v1540_v50  ;;  %v1495_v57 = vpop.f32.mrb[2].mxu0  ;;  %v1543_v58 = vpop.f32.mrb[2].mxu1  ;;  %v407_v49 = vld [vmem:[#allocation2 + $0xb0] sm:$0xff] }
 0x194   : > { %v1496_v60 = vpop.f32.mrb[3].mxu0  ;;  %v1544_v62 = vpop.f32.mrb[3].mxu1 }
 0x195   : > { %v898_v63 = vadd.f32 %v1494_v55, %v385_v51  ;;  %v914_v0 = vadd.f32 %v1542_v56, %v401_v53  ;;  %v1497_v1 = vadd.f32 %v1496_v60, %v1495_v57  ;;  %v1545_v2 = vadd.f32 %v1544_v62, %v1543_v58  ;;  %v392_v55 = vld [vmem:[#allocation2 + $0x38] sm:$0xff] }
 0x196   : > { %v408_v57 = vld [vmem:[#allocation2 + $0xb8] sm:$0xff] }
 0x197   : > { %931 = vst.msk [vmem:[#allocation2] sm:$0xff] %vm930_vm1, %v898_v63  ;;  %947 = vst.msk [vmem:[#allocation2 + $0x80] sm:$0xff] %vm930_vm1, %v914_v0  ;;  %v899_v3 = vadd.f32 %v1497_v1, %v386_v59  ;;  %v915_v4 = vadd.f32 %v1545_v2, %v402_v61 }
 0x199   : > { %932 = vst.msk [vmem:[#allocation2 + $0x8] sm:$0xff] %vm930_vm1, %v899_v3  ;;  %948 = vst.msk [vmem:[#allocation2 + $0x88] sm:$0xff] %vm930_vm1, %v915_v4  ;;  %v1498_v5 = vpop.f32.mrb[4].mxu0  ;;  %v1546_v6 = vpop.f32.mrb[4].mxu1  ;;  %v393_v3 = vld [vmem:[#allocation2 + $0x40] sm:$0xff] }
 0x19a   : > { %v1499_v8 = vpop.f32.mrb[5].mxu0  ;;  %v1547_v10 = vpop.f32.mrb[5].mxu1 }
 0x19b   : > { %v1500_v11 = vadd.f32 %v1499_v8, %v1498_v5  ;;  %v1548_v12 = vadd.f32 %v1547_v10, %v1546_v6  ;;  %v1501_v13 = vpop.f32.mrb[6].mxu0  ;;  %v1549_v14 = vpop.f32.mrb[6].mxu1  ;;  %v409_v5 = vld [vmem:[#allocation2 + $0xc0] sm:$0xff] }
 0x19c   : > { %v1502_v16 = vpop.f32.mrb[7].mxu0  ;;  %v1550_v18 = vpop.f32.mrb[7].mxu1 }
 0x19d   : > { %v900_v19 = vadd.f32 %v1500_v11, %v387_v7  ;;  %v916_v20 = vadd.f32 %v1548_v12, %v403_v9  ;;  %v1503_v21 = vadd.f32 %v1502_v16, %v1501_v13  ;;  %v1551_v22 = vadd.f32 %v1550_v18, %v1549_v14  ;;  %v394_v11 = vld [vmem:[#allocation2 + $0x48] sm:$0xff] }
 0x19e   : > { %v410_v13 = vld [vmem:[#allocation2 + $0xc8] sm:$0xff] }
 0x19f   : > { %933 = vst.msk [vmem:[#allocation2 + $0x10] sm:$0xff] %vm930_vm1, %v900_v19  ;;  %949 = vst.msk [vmem:[#allocation2 + $0x90] sm:$0xff] %vm930_vm1, %v916_v20  ;;  %v901_v23 = vadd.f32 %v1503_v21, %v388_v15  ;;  %v917_v24 = vadd.f32 %v1551_v22, %v404_v17 }
 0x1a1   : > { %934 = vst.msk [vmem:[#allocation2 + $0x18] sm:$0xff] %vm930_vm1, %v901_v23  ;;  %950 = vst.msk [vmem:[#allocation2 + $0x98] sm:$0xff] %vm930_vm1, %v917_v24  ;;  %v1504_v25 = vpop.f32.mrb[8].mxu0  ;;  %v1552_v26 = vpop.f32.mrb[8].mxu1  ;;  %v395_v23 = vld [vmem:[#allocation2 + $0x50] sm:$0xff] }
 0x1a2   : > { %v1505_v28 = vpop.f32.mrb[9].mxu0  ;;  %v1553_v30 = vpop.f32.mrb[9].mxu1 }
 0x1a3   : > { %v1506_v31 = vadd.f32 %v1505_v28, %v1504_v25  ;;  %v1554_v32 = vadd.f32 %v1553_v30, %v1552_v26  ;;  %v1507_v33 = vpop.f32.mrb[10].mxu0  ;;  %v1555_v34 = vpop.f32.mrb[10].mxu1  ;;  %v411_v25 = vld [vmem:[#allocation2 + $0xd0] sm:$0xff] }
 0x1a4   : > { %v1508_v36 = vpop.f32.mrb[11].mxu0  ;;  %v1556_v38 = vpop.f32.mrb[11].mxu1 }
 0x1a5   : > { %v902_v39 = vadd.f32 %v1506_v31, %v389_v27  ;;  %v918_v40 = vadd.f32 %v1554_v32, %v405_v29  ;;  %v1509_v41 = vadd.f32 %v1508_v36, %v1507_v33  ;;  %v1557_v42 = vadd.f32 %v1556_v38, %v1555_v34  ;;  %v396_v31 = vld [vmem:[#allocation2 + $0x58] sm:$0xff] }
 0x1a6   : > { %v412_v33 = vld [vmem:[#allocation2 + $0xd8] sm:$0xff] }
 0x1a7   : > { %935 = vst.msk [vmem:[#allocation2 + $0x20] sm:$0xff] %vm930_vm1, %v902_v39  ;;  %951 = vst.msk [vmem:[#allocation2 + $0xa0] sm:$0xff] %vm930_vm1, %v918_v40  ;;  %v903_v43 = vadd.f32 %v1509_v41, %v390_v35  ;;  %v919_v44 = vadd.f32 %v1557_v42, %v406_v37 }
 0x1a9   : > { %936 = vst.msk [vmem:[#allocation2 + $0x28] sm:$0xff] %vm930_vm1, %v903_v43  ;;  %952 = vst.msk [vmem:[#allocation2 + $0xa8] sm:$0xff] %vm930_vm1, %v919_v44  ;;  %v1510_v45 = vpop.f32.mrb[12].mxu0  ;;  %v1558_v46 = vpop.f32.mrb[12].mxu1  ;;  %v397_v43 = vld [vmem:[#allocation2 + $0x60] sm:$0xff] }
 0x1aa   : > { %v1511_v48 = vpop.f32.mrb[13].mxu0  ;;  %v1559_v50 = vpop.f32.mrb[13].mxu1 }
 0x1ab   : > { %v1512_v51 = vadd.f32 %v1511_v48, %v1510_v45  ;;  %v1560_v52 = vadd.f32 %v1559_v50, %v1558_v46  ;;  %v1513_v53 = vpop.f32.mrb[14].mxu0  ;;  %v1561_v54 = vpop.f32.mrb[14].mxu1  ;;  %v413_v45 = vld [vmem:[#allocation2 + $0xe0] sm:$0xff] }
 0x1ac   : > { %v1514_v56 = vpop.f32.mrb[15].mxu0  ;;  %v1562_v58 = vpop.f32.mrb[15].mxu1 }
 0x1ad   : > { %v904_v59 = vadd.f32 %v1512_v51, %v391_v47  ;;  %v920_v60 = vadd.f32 %v1560_v52, %v407_v49  ;;  %v1515_v61 = vadd.f32 %v1514_v56, %v1513_v53  ;;  %v1563_v62 = vadd.f32 %v1562_v58, %v1561_v54  ;;  %v398_v51 = vld [vmem:[#allocation2 + $0x68] sm:$0xff] }
 0x1ae   : > { %v414_v53 = vld [vmem:[#allocation2 + $0xe8] sm:$0xff] }
 0x1af   : > { %937 = vst.msk [vmem:[#allocation2 + $0x30] sm:$0xff] %vm930_vm1, %v904_v59  ;;  %953 = vst.msk [vmem:[#allocation2 + $0xb0] sm:$0xff] %vm930_vm1, %v920_v60  ;;  %v905_v63 = vadd.f32 %v1515_v61, %v392_v55  ;;  %v921_v0 = vadd.f32 %v1563_v62, %v408_v57 }
 0x1b1   : > { %938 = vst.msk [vmem:[#allocation2 + $0x38] sm:$0xff] %vm930_vm1, %v905_v63  ;;  %954 = vst.msk [vmem:[#allocation2 + $0xb8] sm:$0xff] %vm930_vm1, %v921_v0  ;;  %v1516_v1 = vpop.f32.mrb[16].mxu0  ;;  %v1564_v2 = vpop.f32.mrb[16].mxu1  ;;  %v399_v63 = vld [vmem:[#allocation2 + $0x70] sm:$0xff] }
 0x1b2   : > { %v1517_v4 = vpop.f32.mrb[17].mxu0  ;;  %v1565_v6 = vpop.f32.mrb[17].mxu1 }
 0x1b3   : > { %v1518_v7 = vadd.f32 %v1517_v4, %v1516_v1  ;;  %v1566_v8 = vadd.f32 %v1565_v6, %v1564_v2  ;;  %v1519_v9 = vpop.f32.mrb[18].mxu0  ;;  %v1567_v10 = vpop.f32.mrb[18].mxu1  ;;  %v415_v1 = vld [vmem:[#allocation2 + $0xf0] sm:$0xff] }
 0x1b4   : > { %v1520_v12 = vpop.f32.mrb[19].mxu0  ;;  %v1568_v14 = vpop.f32.mrb[19].mxu1 }
 0x1b5   : > { %v906_v15 = vadd.f32 %v1518_v7, %v393_v3  ;;  %v922_v16 = vadd.f32 %v1566_v8, %v409_v5  ;;  %v1521_v17 = vadd.f32 %v1520_v12, %v1519_v9  ;;  %v1569_v18 = vadd.f32 %v1568_v14, %v1567_v10  ;;  %v400_v7 = vld [vmem:[#allocation2 + $0x78] sm:$0xff] }
 0x1b6   : > { %v416_v9 = vld [vmem:[#allocation2 + $0xf8] sm:$0xff] }
 0x1b7   : > { %939 = vst.msk [vmem:[#allocation2 + $0x40] sm:$0xff] %vm930_vm1, %v906_v15  ;;  %955 = vst.msk [vmem:[#allocation2 + $0xc0] sm:$0xff] %vm930_vm1, %v922_v16  ;;  %v907_v19 = vadd.f32 %v1521_v17, %v394_v11  ;;  %v923_v20 = vadd.f32 %v1569_v18, %v410_v13 }
 0x1b9   : > { %940 = vst.msk [vmem:[#allocation2 + $0x48] sm:$0xff] %vm930_vm1, %v907_v19  ;;  %956 = vst.msk [vmem:[#allocation2 + $0xc8] sm:$0xff] %vm930_vm1, %v923_v20  ;;  %v1522_v21 = vpop.f32.mrb[20].mxu0  ;;  %v1570_v22 = vpop.f32.mrb[20].mxu1 }
 0x1ba   : > { %v1523_v24 = vpop.f32.mrb[21].mxu0  ;;  %v1571_v26 = vpop.f32.mrb[21].mxu1 }
 0x1bb   : > { %v1524_v27 = vadd.f32 %v1523_v24, %v1522_v21  ;;  %v1572_v28 = vadd.f32 %v1571_v26, %v1570_v22  ;;  %v1525_v29 = vpop.f32.mrb[22].mxu0  ;;  %v1573_v30 = vpop.f32.mrb[22].mxu1 }
 0x1bc   : > { %v1526_v32 = vpop.f32.mrb[23].mxu0  ;;  %v1574_v34 = vpop.f32.mrb[23].mxu1 }
 0x1bd   : > { %v908_v35 = vadd.f32 %v1524_v27, %v395_v23  ;;  %v924_v36 = vadd.f32 %v1572_v28, %v411_v25  ;;  %v1527_v37 = vadd.f32 %v1526_v32, %v1525_v29  ;;  %v1575_v38 = vadd.f32 %v1574_v34, %v1573_v30 }
 0x1bf   : > { %941 = vst.msk [vmem:[#allocation2 + $0x50] sm:$0xff] %vm930_vm1, %v908_v35  ;;  %957 = vst.msk [vmem:[#allocation2 + $0xd0] sm:$0xff] %vm930_vm1, %v924_v36  ;;  %v909_v39 = vadd.f32 %v1527_v37, %v396_v31  ;;  %v925_v40 = vadd.f32 %v1575_v38, %v412_v33 }
 0x1c1   : > { %942 = vst.msk [vmem:[#allocation2 + $0x58] sm:$0xff] %vm930_vm1, %v909_v39  ;;  %958 = vst.msk [vmem:[#allocation2 + $0xd8] sm:$0xff] %vm930_vm1, %v925_v40  ;;  %v1528_v41 = vpop.f32.mrb[24].mxu0  ;;  %v1576_v42 = vpop.f32.mrb[24].mxu1 }
 0x1c2   : > { %v1529_v44 = vpop.f32.mrb[25].mxu0  ;;  %v1577_v46 = vpop.f32.mrb[25].mxu1 }
 0x1c3   : > { %v1530_v47 = vadd.f32 %v1529_v44, %v1528_v41  ;;  %v1578_v48 = vadd.f32 %v1577_v46, %v1576_v42  ;;  %v1531_v49 = vpop.f32.mrb[26].mxu0  ;;  %v1579_v50 = vpop.f32.mrb[26].mxu1 }
 0x1c4   : > { %v1532_v52 = vpop.f32.mrb[27].mxu0  ;;  %v1580_v54 = vpop.f32.mrb[27].mxu1 }
 0x1c5   : > { %v910_v55 = vadd.f32 %v1530_v47, %v397_v43  ;;  %v926_v56 = vadd.f32 %v1578_v48, %v413_v45  ;;  %v1533_v57 = vadd.f32 %v1532_v52, %v1531_v49  ;;  %v1581_v58 = vadd.f32 %v1580_v54, %v1579_v50 }
 0x1c7   : > { %943 = vst.msk [vmem:[#allocation2 + $0x60] sm:$0xff] %vm930_vm1, %v910_v55  ;;  %959 = vst.msk [vmem:[#allocation2 + $0xe0] sm:$0xff] %vm930_vm1, %v926_v56  ;;  %v911_v59 = vadd.f32 %v1533_v57, %v398_v51  ;;  %v927_v60 = vadd.f32 %v1581_v58, %v414_v53 }
 0x1c9   : > { %944 = vst.msk [vmem:[#allocation2 + $0x68] sm:$0xff] %vm930_vm1, %v911_v59  ;;  %960 = vst.msk [vmem:[#allocation2 + $0xe8] sm:$0xff] %vm930_vm1, %v927_v60  ;;  %v1534_v61 = vpop.f32.mrb[28].mxu0  ;;  %v1582_v62 = vpop.f32.mrb[28].mxu1 }
 0x1ca   : > { %v1535_v0 = vpop.f32.mrb[29].mxu0  ;;  %v1583_v2 = vpop.f32.mrb[29].mxu1 }
 0x1cb   : > { %v1536_v3 = vadd.f32 %v1535_v0, %v1534_v61  ;;  %v1584_v4 = vadd.f32 %v1583_v2, %v1582_v62  ;;  %v1537_v5 = vpop.f32.mrb[30].mxu0  ;;  %v1585_v6 = vpop.f32.mrb[30].mxu1 }
 0x1cc   : > { %v1538_v8 = vpop.f32.mrb[31].mxu0  ;;  %v1586_v10 = vpop.f32.mrb[31].mxu1 }
 0x1cd   : > { %v912_v11 = vadd.f32 %v1536_v3, %v399_v63  ;;  %v928_v12 = vadd.f32 %v1584_v4, %v415_v1  ;;  %v1539_v13 = vadd.f32 %v1538_v8, %v1537_v5  ;;  %v1587_v14 = vadd.f32 %v1586_v10, %v1585_v6 }
 0x1cf   : > { %945 = vst.msk [vmem:[#allocation2 + $0x70] sm:$0xff] %vm930_vm1, %v912_v11  ;;  %961 = vst.msk [vmem:[#allocation2 + $0xf0] sm:$0xff] %vm930_vm1, %v928_v12  ;;  %v913_v15 = vadd.f32 %v1539_v13, %v400_v7  ;;  %v929_v16 = vadd.f32 %v1587_v14, %v416_v9 }
 0x1d1   : > { %946 = vst.msk [vmem:[#allocation2 + $0x78] sm:$0xff] %vm930_vm1, %v913_v15  ;;  %962 = vst.msk [vmem:[#allocation2 + $0xf8] sm:$0xff] %vm930_vm1, %v929_v16 }
 0x1d2 PF: > { %p1408_p6 = scmp.ne.s32.totalorder %s1895_s15, 1 }
 0x1d3   : > { %v967_v17 = vld [vmem:[#allocation2] sm:$0xff] (!%p1408_p6)  ;;  %v968_v19 = vld [vmem:[#allocation2 + $0x8] sm:$0xff] (!%p1408_p6)  ;;  %v969_v22 = vld [vmem:[#allocation2 + $0x10] sm:$0xff] (!%p1408_p6)  ;;  %vm1198_vm2 = vcmask (!%p1408_p6), 257024  }
 0x1d4   : > { %966 = sbr.rel (%p1408_p6) target bundleno = 497 (0x1f1), region = 52  ;;  %v2289_v18 = vld [vmem:[#allocation8] ss:$0 sm:$0xff] (!%p1408_p6)  ;;  %v970_v23 = vld [vmem:[#allocation2 + $0x18] sm:$0xff] (!%p1408_p6)  ;;  %v972_v28 = vld [vmem:[#allocation2 + $0x28] sm:$0xff] (!%p1408_p6) }
 0x1d5   : > { %v1006_v20 = vadd.f32 (!%p1408_p6), %v2289_v18, %v967_v17  ;;  %v1007_v21 = vadd.f32 (!%p1408_p6), %v2289_v18, %v968_v19  ;;  %v971_v24 = vld [vmem:[#allocation2 + $0x20] sm:$0xff] (!%p1408_p6)  ;;  %v1008_v25 = vadd.f32 (!%p1408_p6), %v2289_v18, %v969_v22  ;;  %v1009_v26 = vadd.f32 (!%p1408_p6), %v2289_v18, %v970_v23  ;;  %v973_v29 = vld [vmem:[#allocation2 + $0x30] sm:$0xff] (!%p1408_p6)  ;;  %v974_v30 = vld [vmem:[#allocation2 + $0x38] sm:$0xff] (!%p1408_p6) }
 0x1d6   : > { %v1010_v27 = vadd.f32 (!%p1408_p6), %v2289_v18, %v971_v24  ;;  %v1011_v33 = vadd.f32 (!%p1408_p6), %v2289_v18, %v972_v28  ;;  %v1012_v34 = vadd.f32 (!%p1408_p6), %v2289_v18, %v973_v29  ;;  %v1013_v38 = vadd.f32 (!%p1408_p6), %v2289_v18, %v974_v30  ;;  %v975_v39 = vld [vmem:[#allocation2 + $0x40] sm:$0xff] (!%p1408_p6)  ;;  %v976_v40 = vld [vmem:[#allocation2 + $0x48] sm:$0xff] (!%p1408_p6)  ;;  %v977_v45 = vld [vmem:[#allocation2 + $0x50] sm:$0xff] (!%p1408_p6) }
 0x1d7   : > { %v1038_v31 = vmax.f32 (!%p1408_p6), %v1006_v20, 0.0  ;;  %v1039_v32 = vmax.f32 (!%p1408_p6), %v1007_v21, 0.0  ;;  %v1040_v35 = vmax.f32 (!%p1408_p6), %v1008_v25, 0.0  ;;  %v1041_v36 = vmax.f32 (!%p1408_p6), %v1009_v26, 0.0  ;;  %v978_v46 = vld [vmem:[#allocation2 + $0x58] sm:$0xff] (!%p1408_p6)  ;;  %v979_v47 = vld [vmem:[#allocation2 + $0x60] sm:$0xff] (!%p1408_p6) }
 0x1d8   : > { %v1042_v37 = vmax.f32 (!%p1408_p6), %v1010_v27, 0.0  ;;  %v1043_v43 = vmax.f32 (!%p1408_p6), %v1011_v33, 0.0  ;;  %v1044_v44 = vmax.f32 (!%p1408_p6), %v1012_v34, 0.0  ;;  %v1045_v51 = vmax.f32 (!%p1408_p6), %v1013_v38, 0.0  ;;  %v980_v52 = vld [vmem:[#allocation2 + $0x68] sm:$0xff] (!%p1408_p6)  ;;  %v981_v53 = vld [vmem:[#allocation2 + $0x70] sm:$0xff] (!%p1408_p6) }
 0x1d9   : > { %v1444_v41 = vpack.c.bf16 (!%p1408_p6), %v1038_v31, %v1038_v31  ;;  %v1445_v42 = vpack.c.bf16 (!%p1408_p6), %v1039_v32, %v1039_v32  ;;  %v1446_v48 = vpack.c.bf16 (!%p1408_p6), %v1040_v35, %v1040_v35  ;;  %v1447_v49 = vpack.c.bf16 (!%p1408_p6), %v1041_v36, %v1041_v36  ;;  %v982_v58 = vld [vmem:[#allocation2 + $0x78] sm:$0xff] (!%p1408_p6)  ;;  %v983_v7 = vld [vmem:[#allocation2 + $0x80] sm:$0xff] (!%p1408_p6)  ;;  %v984_v8 = vld [vmem:[#allocation2 + $0x88] sm:$0xff] (!%p1408_p6) }
 0x1da   : > { %v1448_v50 = vpack.c.bf16 (!%p1408_p6), %v1042_v37, %v1042_v37  ;;  %v1449_v54 = vpack.c.bf16 (!%p1408_p6), %v1043_v43, %v1043_v43  ;;  %v1450_v55 = vpack.c.bf16 (!%p1408_p6), %v1044_v44, %v1044_v44  ;;  %v1014_v56 = vadd.f32 (!%p1408_p6), %v2289_v18, %v975_v39  ;;  %v985_v13 = vld [vmem:[#allocation2 + $0x90] sm:$0xff] (!%p1408_p6)  ;;  %v986_v14 = vld [vmem:[#allocation2 + $0x98] sm:$0xff] (!%p1408_p6)  ;;  %v987_v15 = vld [vmem:[#allocation2 + $0xa0] sm:$0xff] (!%p1408_p6) }
 0x1db   : > { %1199 = vst.msk [vmem:[%s2166_s7] sm:$0xf] %vm1198_vm2, %v1444_v41  ;;  %1200 = vst.msk [vmem:[%s2166_s7 + $0x4] sm:$0xf] %vm1198_vm2, %v1445_v42  ;;  %v1015_v57 = vadd.f32 %v2289_v18, %v976_v40  ;;  %v1451_v59 = vpack.c.bf16 %v1045_v51, %v1045_v51  ;;  %v1016_v60 = vadd.f32 %v2289_v18, %v977_v45  ;;  %v988_v21 = vld [vmem:[#allocation2 + $0xa8] sm:$0xff]  ;;  %v989_v22 = vld [vmem:[#allocation2 + $0xb0] sm:$0xff] }
 0x1dc   : > { %1201 = vst.msk [vmem:[%s2166_s7 + $0x8] sm:$0xf] %vm1198_vm2, %v1446_v48  ;;  %1202 = vst.msk [vmem:[%s2166_s7 + $0xc] sm:$0xf] %vm1198_vm2, %v1447_v49  ;;  %v1017_v61 = vadd.f32 %v2289_v18, %v978_v46  ;;  %v1018_v62 = vadd.f32 %v2289_v18, %v979_v47  ;;  %v1046_v63 = vmax.f32 %v1014_v56, 0.0  ;;  %v1019_v1 = vadd.f32 %v2289_v18, %v980_v52  ;;  %v990_v27 = vld [vmem:[#allocation2 + $0xb8] sm:$0xff] }
 0x1dd   : > { %1203 = vst.msk [vmem:[%s2166_s7 + $0x10] sm:$0xf] %vm1198_vm2, %v1448_v50  ;;  %1204 = vst.msk [vmem:[%s2166_s7 + $0x14] sm:$0xf] %vm1198_vm2, %v1449_v54  ;;  %v1047_v0 = vmax.f32 %v1015_v57, 0.0  ;;  %v1020_v2 = vadd.f32 %v2289_v18, %v981_v53  ;;  %v1048_v3 = vmax.f32 %v1016_v60, 0.0  ;;  %v1021_v6 = vadd.f32 %v2289_v18, %v982_v58 }
 0x1de   : > { %1205 = vst.msk [vmem:[%s2166_s7 + $0x18] sm:$0xf] %vm1198_vm2, %v1450_v55  ;;  %1206 = vst.msk [vmem:[%s2166_s7 + $0x1c] sm:$0xf] %vm1198_vm2, %v1451_v59  ;;  %v1049_v4 = vmax.f32 %v1017_v61, 0.0  ;;  %v1050_v5 = vmax.f32 %v1018_v62, 0.0  ;;  %v1452_v9 = vpack.c.bf16 %v1046_v63, %v1046_v63  ;;  %v1022_v25 = vadd.f32 %v2289_v18, %v983_v7 }
 0x1df   : > { %v1453_v10 = vpack.c.bf16 %v1047_v0, %v1047_v0  ;;  %v1051_v11 = vmax.f32 %v1019_v1, 0.0  ;;  %v1052_v12 = vmax.f32 %v1020_v2, 0.0  ;;  %v1454_v16 = vpack.c.bf16 %v1048_v3, %v1048_v3  ;;  %v991_v40 = vld [vmem:[#allocation2 + $0xc0] sm:$0xff]  ;;  %v992_v41 = vld [vmem:[#allocation2 + $0xc8] sm:$0xff]  ;;  %v993_v46 = vld [vmem:[#allocation2 + $0xd0] sm:$0xff] }
 0x1e0   : > { %v1455_v17 = vpack.c.bf16 %v1049_v4, %v1049_v4  ;;  %v1456_v19 = vpack.c.bf16 %v1050_v5, %v1050_v5  ;;  %v1053_v20 = vmax.f32 %v1021_v6, 0.0  ;;  %1207 = vst.msk [vmem:[%s2166_s7 + $0x20] sm:$0xf] %vm1198_vm2, %v1452_v9  ;;  %v1023_v26 = vadd.f32 %v2289_v18, %v984_v8  ;;  %v994_v47 = vld [vmem:[#allocation2 + $0xd8] sm:$0xff]  ;;  %v995_v48 = vld [vmem:[#allocation2 + $0xe0] sm:$0xff]  ;;  %v996_v53 = vld [vmem:[#allocation2 + $0xe8] sm:$0xff] }
 0x1e1   : > { %1208 = vst.msk [vmem:[%s2166_s7 + $0x24] sm:$0xf] %vm1198_vm2, %v1453_v10  ;;  %v1457_v23 = vpack.c.bf16 %v1051_v11, %v1051_v11  ;;  %v1458_v24 = vpack.c.bf16 %v1052_v12, %v1052_v12  ;;  %1209 = vst.msk [vmem:[%s2166_s7 + $0x28] sm:$0xf] %vm1198_vm2, %v1454_v16  ;;  %v1024_v29 = vadd.f32 %v2289_v18, %v985_v13  ;;  %v1054_v32 = vmax.f32 %v1022_v25, 0.0  ;;  %v997_v54 = vld [vmem:[#allocation2 + $0xf0] sm:$0xff] }
 0x1e2   : > { %1210 = vst.msk [vmem:[%s2166_s7 + $0x2c] sm:$0xf] %vm1198_vm2, %v1455_v17  ;;  %1211 = vst.msk [vmem:[%s2166_s7 + $0x30] sm:$0xf] %vm1198_vm2, %v1456_v19  ;;  %v1459_v28 = vpack.c.bf16 %v1053_v20, %v1053_v20  ;;  %v1025_v30 = vadd.f32 %v2289_v18, %v986_v14  ;;  %v1026_v31 = vadd.f32 %v2289_v18, %v987_v15  ;;  %v1055_v33 = vmax.f32 %v1023_v26, 0.0  ;;  %v998_v59 = vld [vmem:[#allocation2 + $0xf8] sm:$0xff] }
 0x1e3   : > { %1212 = vst.msk [vmem:[%s2166_s7 + $0x34] sm:$0xf] %vm1198_vm2, %v1457_v23  ;;  %1213 = vst.msk [vmem:[%s2166_s7 + $0x38] sm:$0xf] %vm1198_vm2, %v1458_v24  ;;  %v1027_v34 = vadd.f32 %v2289_v18, %v988_v21  ;;  %v1028_v35 = vadd.f32 %v2289_v18, %v989_v22  ;;  %v1056_v36 = vmax.f32 %v1024_v29, 0.0  ;;  %v1029_v39 = vadd.f32 %v2289_v18, %v990_v27 }
 0x1e4   : > { %1214 = vst.msk [vmem:[%s2166_s7 + $0x3c] sm:$0xf] %vm1198_vm2, %v1459_v28  ;;  %v1057_v37 = vmax.f32 %v1025_v30, 0.0  ;;  %v1058_v38 = vmax.f32 %v1026_v31, 0.0  ;;  %v1460_v42 = vpack.c.bf16 %v1054_v32, %v1054_v32  ;;  %v1461_v43 = vpack.c.bf16 %v1055_v33, %v1055_v33 }
 0x1e5   : > { %v1059_v44 = vmax.f32 %v1027_v34, 0.0  ;;  %v1060_v45 = vmax.f32 %v1028_v35, 0.0  ;;  %v1462_v49 = vpack.c.bf16 %v1056_v36, %v1056_v36  ;;  %v1061_v52 = vmax.f32 %v1029_v39, 0.0 }
 0x1e6   : > { %v1463_v50 = vpack.c.bf16 %v1057_v37, %v1057_v37  ;;  %v1464_v51 = vpack.c.bf16 %v1058_v38, %v1058_v38  ;;  %1215 = vst.msk [vmem:[%s2166_s7 + $0x40] sm:$0xf] %vm1198_vm2, %v1460_v42  ;;  %1216 = vst.msk [vmem:[%s2166_s7 + $0x44] sm:$0xf] %vm1198_vm2, %v1461_v43  ;;  %v1030_v57 = vadd.f32 %v2289_v18, %v991_v40 }
 0x1e7   : > { %v1465_v55 = vpack.c.bf16 %v1059_v44, %v1059_v44  ;;  %v1466_v56 = vpack.c.bf16 %v1060_v45, %v1060_v45  ;;  %v1031_v58 = vadd.f32 %v2289_v18, %v992_v41  ;;  %1217 = vst.msk [vmem:[%s2166_s7 + $0x48] sm:$0xf] %vm1198_vm2, %v1462_v49  ;;  %v1467_v60 = vpack.c.bf16 %v1061_v52, %v1061_v52 }
 0x1e8   : > { %1218 = vst.msk [vmem:[%s2166_s7 + $0x4c] sm:$0xf] %vm1198_vm2, %v1463_v50  ;;  %1219 = vst.msk [vmem:[%s2166_s7 + $0x50] sm:$0xf] %vm1198_vm2, %v1464_v51  ;;  %v1032_v61 = vadd.f32 %v2289_v18, %v993_v46  ;;  %v1033_v62 = vadd.f32 %v2289_v18, %v994_v47  ;;  %v1034_v63 = vadd.f32 %v2289_v18, %v995_v48  ;;  %v1062_v0 = vmax.f32 %v1030_v57, 0.0 }
 0x1e9   : > { %1220 = vst.msk [vmem:[%s2166_s7 + $0x54] sm:$0xf] %vm1198_vm2, %v1465_v55  ;;  %1221 = vst.msk [vmem:[%s2166_s7 + $0x58] sm:$0xf] %vm1198_vm2, %v1466_v56  ;;  %v1063_v1 = vmax.f32 %v1031_v58, 0.0  ;;  %v1035_v2 = vadd.f32 %v2289_v18, %v996_v53  ;;  %v1036_v3 = vadd.f32 %v2289_v18, %v997_v54  ;;  %v1037_v7 = vadd.f32 %v2289_v18, %v998_v59 }
 0x1ea   : > { %1222 = vst.msk [vmem:[%s2166_s7 + $0x5c] sm:$0xf] %vm1198_vm2, %v1467_v60  ;;  %v1064_v4 = vmax.f32 %v1032_v61, 0.0  ;;  %v1065_v5 = vmax.f32 %v1033_v62, 0.0  ;;  %v1066_v6 = vmax.f32 %v1034_v63, 0.0  ;;  %v1468_v8 = vpack.c.bf16 %v1062_v0, %v1062_v0 }
 0x1eb   : > { %v1469_v9 = vpack.c.bf16 %v1063_v1, %v1063_v1  ;;  %v1067_v10 = vmax.f32 %v1035_v2, 0.0  ;;  %v1068_v11 = vmax.f32 %v1036_v3, 0.0  ;;  %v1069_v15 = vmax.f32 %v1037_v7, 0.0 }
 0x1ec   : > { %v1470_v12 = vpack.c.bf16 %v1064_v4, %v1064_v4  ;;  %v1471_v13 = vpack.c.bf16 %v1065_v5, %v1065_v5  ;;  %v1472_v14 = vpack.c.bf16 %v1066_v6, %v1066_v6  ;;  %1223 = vst.msk [vmem:[%s2166_s7 + $0x60] sm:$0xf] %vm1198_vm2, %v1468_v8 }
 0x1ed   : > { %1224 = vst.msk [vmem:[%s2166_s7 + $0x64] sm:$0xf] %vm1198_vm2, %v1469_v9  ;;  %v1473_v16 = vpack.c.bf16 %v1067_v10, %v1067_v10  ;;  %v1474_v17 = vpack.c.bf16 %v1068_v11, %v1068_v11  ;;  %v1475_v18 = vpack.c.bf16 %v1069_v15, %v1069_v15 }
 0x1ee   : > { %1225 = vst.msk [vmem:[%s2166_s7 + $0x68] sm:$0xf] %vm1198_vm2, %v1470_v12  ;;  %1226 = vst.msk [vmem:[%s2166_s7 + $0x6c] sm:$0xf] %vm1198_vm2, %v1471_v13 }
 0x1ef   : > { %1227 = vst.msk [vmem:[%s2166_s7 + $0x70] sm:$0xf] %vm1198_vm2, %v1472_v14  ;;  %1228 = vst.msk [vmem:[%s2166_s7 + $0x74] sm:$0xf] %vm1198_vm2, %v1473_v16 }
 0x1f0   : > { %1229 = vst.msk [vmem:[%s2166_s7 + $0x78] sm:$0xf] %vm1198_vm2, %v1474_v17  ;;  %1230 = vst.msk [vmem:[%s2166_s7 + $0x7c] sm:$0xf] %vm1198_vm2, %v1475_v18 }
 0x1f1 PF: > { %s25_s1 = sadd.s32 1, %s1911_s1   ;;  %s2442_s26 = sld [smem:[#allocation15_spill]] }
 0x1f2   : > { %p22_p11 = scmp.ge.s32.totalorder %s25_s1, 8   ;;  %s2443_s0 = smov %s1887_s13 }
 0x1f3   : > { %s2444_s13 = smov %s1891_s14  ;;  %s2445_s14 = smov %s2071_s6 }
 0x1f4   : > { %s2446_s15 = smov %s1903_s17  ;;  %s2447_s16 = smov %s1907_s18 }
 0x1f5   : > { %s2448_s17 = smov %s2451_s20  ;;  %24 = sbr.rel (!%p22_p11) target bundleno = 25 (0x19), region = 91 }
 0x1f7   : > { %s2449_s18 = smov %s2442_s26 }
 0x1fc   :  { %1253 = vsyncpa [#allocation7], 1 }
 0x1fd   :  { %1255 = vsyncpa [#allocation7 + $0x1], 1 }
 0x1fe   :  { %1256 = vsyncpa [#allocation9], 1 }

</bundles_post_ra>
